<compile_context>
chip_gen: v7x
topology: tpu7x:2x2x1
jax: 0.10.0
libtpu: 0.0.40
codegen_flags: <defaults>
</compile_context>

<pallas_src>
import jax
import jax.numpy as jnp
from jax.experimental import pallas as pl
from jax.experimental.pallas import tpu as pltpu


def _proj_kernel(x_ref, w_ref, o_ref):
    # x_ref: (1, C_in, tS)   w_ref: (tco, C_in)   o_ref: (1, tco, tS)
    # dot(w, x) contracts the (small) channel axis; spatial stays on lanes.
    o_ref[0] = jnp.dot(
        w_ref[...], x_ref[0], preferred_element_type=jnp.float32
    ).astype(o_ref.dtype)


def _vmem_capacity_bytes() -> int:
    """Physical VMEM of the current TPU generation (fallback: v7x-sized 64MiB)."""
    try:
        info = pltpu.get_tpu_info()
        cap = getattr(info, "vmem_capacity_bytes", None)
        if cap:
            return int(cap)
    except Exception:
        pass
    return 64 << 20


def _round_up(x: int, m: int) -> int:
    return ((x + m - 1) // m) * m


def projector_block(x_nchw: jax.Array, weight_oi11: jax.Array):
    """1x1 Conv2d (bias=False) forward.

    x_nchw:      (N, C_in, H, W)
    weight_oi11: (C_out, C_in, 1, 1)   -- PyTorch conv weight layout
    returns:     (N, C_out, H, W)
    """
    N, C_in, H, W = x_nchw.shape
    C_out = weight_oi11.shape[0]
    S = H * W

    # Layout glue that is free (contiguous reshapes, no data movement).
    x3 = x_nchw.reshape(N, C_in, S)
    w2 = weight_oi11.reshape(C_out, C_in)

    itemsize = jnp.dtype(x3.dtype).itemsize
    w_itemsize = jnp.dtype(w2.dtype).itemsize

    # --- generation-aware VMEM budget for pipeline buffers -------------------
    vmem_cap = _vmem_capacity_bytes()
    # ~48 MiB of buffers on v7x (64 MiB physical), ~112 MiB on v5e/v6e (128 MiB),
    # leaving headroom for compiler scratch.
    budget = min(vmem_cap - (16 << 20), (vmem_cap * 7) // 8)

    # --- C_out tile: full width when reasonable; otherwise tile with co
    #     innermost so x stays resident across C_out tiles. -------------------
    if C_out <= 1024:
        tco = C_out                     # equals full dim -> always layout-legal
    else:
        tco = 512                       # multiple of 8; ragged edge is masked

    # --- spatial tile: solve tS from the budget, clamp to it (never the
    #     reverse), round to a lane multiple. ---------------------------------
    # Double-buffered footprint: 2*tS*(C_in + tco)*itemsize + 2*tco*C_in*w_item.
    w_buf_bytes = 2 * tco * C_in * w_itemsize
    per_lane = 2 * (C_in + tco) * itemsize
    tS_budget = max(128, ((budget - w_buf_bytes) // per_lane // 128) * 128)

    S_128 = _round_up(S, 128)
    if S_128 <= tS_budget:
        tS = S                          # one full-spatial block (no masking)
    else:
        tS = tS_budget                  # multiple of 128, guaranteed <= S

    co_tiles = pl.cdiv(C_out, tco)
    s_tiles = pl.cdiv(S, tS)

    # Megacore: never hand the chip a single grid step (would idle one v7x TC).
    if N * s_tiles * co_tiles == 1 and S > 128:
        tS = max(128, _round_up(pl.cdiv(S, 2), 128))
        s_tiles = pl.cdiv(S, tS)

    grid = (N, s_tiles, co_tiles)       # co innermost -> x tile stays resident

    # --- scoped VMEM limit: actual buffer footprint + slack, within physical.
    buffers_bytes = 2 * tS * (C_in + tco) * itemsize + w_buf_bytes
    vmem_limit = int(min(vmem_cap, max(buffers_bytes + (8 << 20), 32 << 20)))

    # --- cost estimate (advisory). x is read once (resident across co tiles);
    #     the (tiny) weight is re-read per (n, s) only when C_out is tiled. ---
    w_reads = (N * s_tiles) if co_tiles > 1 else 1
    cost = pl.CostEstimate(
        flops=2 * N * S * C_in * C_out,
        transcendentals=0,
        bytes_accessed=(N * C_in * S * itemsize
                        + w_reads * C_out * C_in * w_itemsize
                        + N * C_out * S * itemsize),
    )

    out3 = pl.pallas_call(
        _proj_kernel,
        out_shape=jax.ShapeDtypeStruct((N, C_out, S), x_nchw.dtype),
        grid_spec=pltpu.PrefetchScalarGridSpec(
            num_scalar_prefetch=0,
            grid=grid,
            in_specs=[
                # x: (1, C_in, tS) — channels on sublanes, spatial on lanes.
                # Index is constant along the innermost (co) axis -> resident.
                pl.BlockSpec((1, C_in, tS), lambda n, s, co: (n, 0, s)),
                # w: (tco, C_in) — tiny; constant across everything when
                # co_tiles == 1, otherwise cycled along the innermost axis.
                pl.BlockSpec((tco, C_in), lambda n, s, co: (co, 0)),
            ],
            out_specs=pl.BlockSpec((1, tco, tS), lambda n, s, co: (n, co, s)),
        ),
        compiler_params=pltpu.CompilerParams(
            dimension_semantics=("parallel", "parallel", "parallel"),
            vmem_limit_bytes=vmem_limit,
        ),
        cost_estimate=cost,
    )(x3, w2)

    return out3.reshape(N, C_out, H, W)


if __name__ == "__main__":
    # Small shapes consistent with the module: batch=2, in_features=4,
    # out_features=8, spatial=16x16.
    key = jax.random.PRNGKey(0)
    kx, kw = jax.random.split(key)

    N, C_in, C_out, H, W = 2, 4, 8, 16, 16
    x = jax.random.normal(kx, (N, C_in, H, W), dtype=jnp.float32)
    # Deterministic weight, PyTorch conv layout (C_out, C_in, 1, 1).
    weight = jax.random.normal(kw, (C_out, C_in, 1, 1), dtype=jnp.float32) * 0.1

    out = projector_block(x, weight)
    out = jax.block_until_ready(out)

    # Reference: plain-JAX 1x1 conv as a channel einsum.
    ref = jnp.einsum("nchw,oc->nohw", x, weight[:, :, 0, 0])
    assert out.shape == (N, C_out, H, W)
    assert jnp.allclose(out, ref, atol=1e-5, rtol=1e-5)

    print("KERNEL_OK")
</pallas_src>

<mosaic_0001>
module attributes {stable_mosaic.version = 11 : i64} {
  func.func @_proj_kernel(%arg0: i32, %arg1: i32, %arg2: i32, %arg3: memref<1x4x256xf32, #tpu.memory_space<vmem>>, %arg4: memref<8x4xf32, #tpu.memory_space<vmem>>, %arg5: memref<1x8x256xf32, #tpu.memory_space<vmem>>) attributes {dimension_semantics = [#tpu.dimension_semantics<parallel>, #tpu.dimension_semantics<parallel>, #tpu.dimension_semantics<parallel>], iteration_bounds = array<i64: 2, 1, 1>, scalar_prefetch = 0 : i64, scratch_operands = 0 : i64, tpu.core_type = #tpu.core_type<tc>, window_params = [{transform_indices = @transform_0, window_bounds = array<i64: 1, 4, 256>}, {transform_indices = @transform_1, window_bounds = array<i64: 8, 4>}, {transform_indices = @transform_2, window_bounds = array<i64: 1, 8, 256>}]} {
    %c0 = arith.constant 0 : index
    %c0_0 = arith.constant 0 : index
    %0 = vector.load %arg4[%c0, %c0_0] : memref<8x4xf32, #tpu.memory_space<vmem>>, vector<8x4xf32>
    %c0_1 = arith.constant 0 : index
    %c0_2 = arith.constant 0 : index
    %c0_3 = arith.constant 0 : index
    %1 = vector.load %arg3[%c0_1, %c0_2, %c0_3] : memref<1x4x256xf32, #tpu.memory_space<vmem>>, vector<1x4x256xf32>
    %2 = vector.shape_cast %1 : vector<1x4x256xf32> to vector<4x256xf32>
    %cst = arith.constant dense<0.000000e+00> : vector<8x256xf32>
    %3 = tpu.matmul %0, %2, %cst {dimension_numbers = #tpu.dot_dimension_numbers<[1], [0], [0], [1], [0, 0, 1, 1], [], []>} : vector<8x4xf32>, vector<4x256xf32>, vector<8x256xf32> -> vector<8x256xf32>
    %c0_4 = arith.constant 0 : index
    %c0_5 = arith.constant 0 : index
    %c0_6 = arith.constant 0 : index
    %4 = vector.load %arg5[%c0_4, %c0_5, %c0_6] : memref<1x8x256xf32, #tpu.memory_space<vmem>>, vector<1x8x256xf32>
    %5 = vector.shape_cast %4 : vector<1x8x256xf32> to vector<8x256xf32>
    %6 = vector.shape_cast %3 : vector<8x256xf32> to vector<1x8x256xf32>
    tpu.vector_store %arg5[%c0_4, %c0_5, %c0_6], %6 {strides = array<i32>} : memref<1x8x256xf32, #tpu.memory_space<vmem>>, vector<1x8x256xf32>,
    return
  }
  func.func @transform_0(%arg0: i32, %arg1: i32, %arg2: i32) -> (i32, i32, i32) {
    %c0_i32 = arith.constant 0 : i32
    %c0_i32_0 = arith.constant 0 : i32
    return %arg0, %c0_i32, %arg1 : i32, i32, i32
  }
  func.func @transform_1(%arg0: i32, %arg1: i32, %arg2: i32) -> (i32, i32) {
    %c0_i32 = arith.constant 0 : i32
    %c0_i32_0 = arith.constant 0 : i32
    return %arg2, %c0_i32 : i32, i32
  }
  func.func @transform_2(%arg0: i32, %arg1: i32, %arg2: i32) -> (i32, i32, i32) {
    %c0_i32 = arith.constant 0 : i32
    return %arg0, %arg2, %arg1 : i32, i32, i32
  }
}

</mosaic_0001>

<bundles_post_ra>
// kernel: tpu_custom_call.1
= control target key start
LH: loop header
LB: loop body
LE: loop exit
PB: predicated region body
PF: predicated region fallthrough
CT: control target
= control target key end

     0   :  { %7 = vsyncpa [#allocation3], 0  ;;  %s808_s0 = inlined_call_operand.hbm [shape: f32[2,4,256], index: 0, kind: input, shape index: {}]   ;;  %s809_s1 = inlined_call_operand.vmem [shape: f32[8,4], index: 1, kind: input, shape index: {}]   ;;  %s810_s2 = inlined_call_operand.hbm [shape: f32[2,8,256], index: 2, kind: output, shape index: {}]  }
   0x1   :  { %9 = vsyncpa [#allocation3 + $0x1], 0 }
   0x2   :  { %10 = vsyncpa [#allocation4], 0 }
   0x3   :  { %12 = vsyncpa [#allocation4 + $0x1], 0  ;;  %s632_s9 = smov 0   ;;  %s634_s10 = smov 0  }
   0x4   :  { %s636_s11 = smov 0   ;;  %s638_s12 = smov 0  }
   0x5   :  { %s640_s13 = smov 0   ;;  %s642_s14 = smov 0  }
   0x6 LB: > { %s415_s15 = sadd.s32 4294967295, %s612_s14   ;;  %s416_s16 = sadd.s32 4294967294, %s612_s14   ;;  %s612_s14 = sphi %s642_s14, %s18_s14   ;;  %s608_s13 = sphi %s640_s13, %s826_s13   ;;  %s604_s12 = sphi %s638_s12, %s825_s12   ;;  %s600_s11 = sphi %s636_s11, %s824_s11   ;;  %s596_s10 = sphi %s634_s10, %s823_s10   ;;  %s592_s9 = sphi %s632_s9, %s822_s9  }
   0x7   : > { %s37_s17 = sadd.s32 1, %s608_s13  ;;  %s46_s18 = sadd.s32 1, %s600_s11 }
   0x8   : > { %p39_p0 = scmp.ge.s32.totalorder %s37_s17, 2  ;;  %p53_p1 = scmp.ne.s32.totalorder %s600_s11, %s596_s10 }
   0x9   : > { %p54_p2 = scmp.eq.s32.totalorder %s612_s14, 0  ;;  %p59_p3 = scmp.ne.s32.totalorder %s596_s10, %s592_s9 }
   0xa   : > { %s828_s17 = smov (%p39_p0, %s37_s17), 0  ;;  %p60_p5 = scmp.eq.s32.totalorder %s415_s15, 0 }
   0xb   : > { %p673_p4 = por %p54_p2, %p53_p1  ;;  %s41_s20 = ssub.s32 %s608_s13, %s828_s17 }
   0xc   : > { %p113_p6 = scmp.eq.s32.totalorder %s415_s15, 1  ;;  %p44_p7 = scmp.eq.s32.totalorder %s41_s20, 0 }
   0xd   : > { %p679_p8 = por %p60_p5, %p59_p3  ;;  %p119_p10 = scmp.eq.s32.totalorder %s416_s16, 1 }
   0xe   : > { %p683_p9 = por %p113_p6, %p53_p1  ;;  %p448_p13 = scmp.lt.s32.totalorder %s612_s14, 2 }
   0xf   : > { %s688_s23 = scalar_select %p44_p7, %s600_s11, %s46_s18  }
  0x10   : > { %s814_s22 = scalar_select %p683_p9, 1, 0 }
  0x11   : > { %p690_p11 = por %p119_p10, %p59_p3  ;;  %s146_s25 = sand.u32 1, %s600_s11  }
  0x12   : > { %s420_s26 = sshll.u32 %s146_s25, 3  ;;  %s434_s27 = sshll.u32 %s608_s13, 7 }
  0x13   : > { %s815_s24 = scalar_select %p690_p11, 1, 0 }
  0x14   : > { %s701_s30 = scalar_lea.hbm %s808_s0, %s434_s27  ;;  %s150_s3 = scalar_lea.vmem [#allocation2], %s420_s26 }
  0x15   : > { %s160_s4 = sshll.u32 %s150_s3, 4  ;;  %p707_p0 = pnand %p448_p13, %p673_p4  ;;  %s703_s4 = int_to_ptr.vmem [resolvable:$true] %s160_s4 }
  0x16   : > { %s147_s6 = scalar_lea.sflag [#allocation3], %s146_s25  ;;  %s500_s7 = scalar_lea.hbm %s701_s30, 128 }
  0x17   : > { %p501_p3 = scmp.ne.s32.totalorder %s701_s30, %s500_s7  ;;  %p502_p5 = pneg %p707_p0 }
  0x18   : > { %s505_s16 = scalar_lea.hbm %s808_s0, 256  ;;  %p506_p4 = scmp.lt.u32.totalorder %s701_s30, %s808_s0 }
  0x19   : > { %p503_p6 = pnand %p502_p5, %p501_p3  ;;  %p507_p10 = scmp.lt.u32.totalorder %s505_s16, %s500_s7 }
  0x1a   : > { %p509_p12 = scmp.lt.u32.totalorder %s500_s7, %s701_s30 }
  0x1b   : > { %p504_p7 = pneg %p503_p6  ;;  %p508_p13 = por %p507_p10, %p506_p4 }
  0x1d   : > { %p510_p1 = por %p509_p12, %p508_p13 }
  0x1f   : > { %p511_p2 = pnand %p510_p1, %p504_p7 }
  0x21   : > { %514 = shalt.err (!%p511_p2)
}
  0x22   : > { %s515_s20 = scalar_lea.vmem %s703_s4, 128  ;;  %s614_s25 = smov [#allocation2]  }
  0x23   : > { %p516_p3 = scmp.ne.s32.totalorder %s703_s4, %s515_s20  ;;  %s520_s26 = sshll.u32 %s614_s25, 4  ;;  %s521_s26 = int_to_ptr.vmem [resolvable:$false] %s520_s26 }
  0x24   : > { %s522_s27 = scalar_lea.vmem %s521_s26, 256  ;;  %p523_p9 = scmp.lt.s32.totalorder %s703_s4, %s521_s26 }
  0x25   : > { %p518_p6 = pnand %p516_p3, %p502_p5  ;;  %p524_p4 = scmp.lt.s32.totalorder %s522_s27, %s515_s20 }
  0x27   : > { %p519_p11 = pneg %p518_p6  ;;  %p525_p10 = por %p524_p4, %p523_p9 }
  0x29   : > { %p526_p12 = pnand %p525_p10, %p519_p11 }
  0x2b   : > { %529 = shalt.err (!%p526_p12)
}
  0x2c   : > { %443 = dma.hbm_to_vmem [thread:$0]  (!%p707_p0), %s701_s30, 128, %s703_s4, %s147_s6  }
  0x2d   : > { %p817_p1 = scmp.lt.s32.totalorder %s612_s14, 3  ;;  %p818_p2 = scmp.ge.s32.totalorder %s612_s14, 1 }
  0x2f   : > { %p166_p5 = pnand %p818_p2, %p817_p1 }
  0x30   : > { %s743_s28 = sand.u32 (!%p166_p5), 1, %s596_s10  }
  0x31   : > { %169 = sbr.rel (%p166_p5) target bundleno = 289 (0x121), region = 28  ;;  %s424_s29 = sshll.u32 (!%p166_p5), %s743_s28, 3 }
  0x32   : > { %s172_s3 = scalar_lea.sflag (!%p166_p5), [#allocation3], %s743_s28  ;;  %s175_s7 = scalar_lea.vmem (!%p166_p5), [#allocation2], %s424_s29 }
  0x38   : > { %583 = dma.done.wait (%p679_p8), %s172_s3, 128  }
  0x39   : > { %585 = vsyncadd (%p679_p8), %s172_s3, 4294967168  ;;  %v615_v0 = vmov 0.0   ;;  %v207_v1 = vld [vmem:[%s175_s7] sm:$0xff]  ;;  %vm214_vm0 = vcmask 1043456   ;;  %vm210_vm1 = vcmask 31744   ;;  %s425_s5 = sshll.u32 %s743_s28, 4 }
  0x3a   : > { %283 = vmatprep.mubr.f32.mxu0 %v615_v0  ;;  %v209_v2 = vcombine.high %v207_v1, %v207_v1  ;;  %v206_v3 = vld [vmem:[%s809_s1] sm:$0xff]  ;;  %s199_s21 = scalar_lea.vmem [#allocation5], %s425_s5  ;;  %s435_s8 = sshll.u32 %s604_s12, 8 }
  0x3b   : > { %s311_s6 = sshll.u32 %s199_s21, 4  ;;  %s761_s18 = scalar_lea.hbm %s810_s2, %s435_s8  ;;  %s756_s6 = int_to_ptr.vmem [resolvable:$true] %s311_s6 }
  0x3c   : > { %426 = vmatprep.subr.msk.mxu0 %vm214_vm0, %v209_v2  ;;  %s293_s19 = scalar_lea.sflag [#allocation4], %s743_s28  ;;  %s530_s20 = scalar_lea.vmem %s756_s6, 256 }
  0x3d   : > { %427 = vmatpush1.msk.msra.mxu0 %vm214_vm0, %v207_v1  ;;  %p531_p8 = scmp.ne.s32.totalorder %s756_s6, %s530_s20  ;;  %p819_p9 = scmp.ne.s32.totalorder %s814_s22, 0 }
  0x3e   : > { %428 = vmatmul.mubr.msk.f32.vlgmr.msra.gmra.mrb[0].mxu0 %vm210_vm1, %v206_v3  ;;  %s616_s12 = smov [#allocation5]  }
  0x3f   : > { %p532_p11 = pnand %p531_p8, %p819_p9  ;;  %s534_s25 = sshll.u32 %s616_s12, 4  ;;  %s535_s25 = int_to_ptr.vmem [resolvable:$false] %s534_s25 }
  0x40   : > { %s536_s26 = scalar_lea.vmem %s535_s25, 512  ;;  %p537_p7 = scmp.lt.s32.totalorder %s756_s6, %s535_s25 }
  0x41   : > { %p533_p0 = pneg %p532_p11  ;;  %p538_p13 = scmp.lt.s32.totalorder %s536_s26, %s530_s20 }
  0x43   : > { %p539_p3 = por %p538_p13, %p537_p7 }
  0x45   : > { %p540_p6 = pnand %p539_p3, %p533_p0 }
 0x111   : > { %v285_v4 = vpop.f32.mrb[0].mxu0 }
 0x112   : > { %290 = vst [vmem:[%s199_s21] sm:$0xff] %v285_v4  ;;  %v287_v5 = vpop.f32.mrb[1].mxu0 }
 0x113   : > { %291 = vst [vmem:[%s199_s21 + $0x8] sm:$0xff] %v287_v5 }
 0x114   : > { %543 = shalt.err (!%p540_p6)
}
 0x115   : > { %s544_s27 = scalar_lea.hbm %s761_s18, 256  ;;  %s548_s3 = scalar_lea.hbm %s810_s2, 512 }
 0x116   : > { %p545_p4 = scmp.ne.s32.totalorder %s761_s18, %s544_s27  ;;  %p549_p1 = scmp.lt.u32.totalorder %s761_s18, %s810_s2 }
 0x117   : > { %p550_p2 = scmp.lt.u32.totalorder %s548_s3, %s544_s27  ;;  %p552_p8 = scmp.lt.u32.totalorder %s544_s27, %s761_s18 }
 0x118   : > { %p546_p10 = pnand %p545_p4, %p819_p9 }
 0x119   : > { %p551_p5 = por %p550_p2, %p549_p1 }
 0x11a   : > { %p547_p12 = pneg %p546_p10 }
 0x11b   : > { %p553_p11 = por %p552_p8, %p551_p5 }
 0x11d   : > { %p554_p0 = pnand %p553_p11, %p547_p12 }
 0x11f   : > { %557 = shalt.err (!%p554_p0)
}
 0x120   : > { %438 = dma.vmem_to_hbm [thread:$0]  (%p819_p9), %s756_s6, 256, %s761_s18, %s293_s19  }
 0x121 PF: > { %s323_s4 = sand.u32 1, %s592_s9   ;;  %p820_p7 = scmp.ne.s32.totalorder %s815_s24, 0 }
 0x122   : > { %p821_p13 = scmp.ge.s32.totalorder %s612_s14, 2  ;;  %s324_s5 = scalar_lea.sflag [#allocation4], %s323_s4 }
 0x124   : > { %p445_p3 = pnand %p821_p13, %p820_p7 }
 0x126   : > { %587 = dma.done.wait (!%p445_p3), %s324_s5, 256  }
 0x127   : > { %589 = vsyncadd (!%p445_p3), %s324_s5, 4294967040  ;;  %s18_s14 = sadd.s32 1, %s612_s14   ;;  %s822_s9 = smov %s596_s10 }
 0x128   : > { %p15_p6 = scmp.ge.s32.totalorder %s18_s14, 4   ;;  %s823_s10 = smov %s600_s11 }
 0x129   : > { %s824_s11 = smov %s688_s23  ;;  %s825_s12 = smov %s608_s13 }
 0x12a   : > { %s826_s13 = smov %s828_s17  ;;  %17 = sbr.rel (!%p15_p6) target bundleno = 6 (0x6), region = 76 }
 0x131   :  { %329 = vsyncpa [#allocation3], 1 }
 0x132   :  { %331 = vsyncpa [#allocation3 + $0x1], 1 }
 0x133   :  { %332 = vsyncpa [#allocation4], 1 }
 0x134   :  { %334 = vsyncpa [#allocation4 + $0x1], 1 }

</bundles_post_ra>
